<compile_context>
chip_gen: v6e
topology: v6e:2x2x1
jax: 0.10.0
libtpu: 0.0.40
codegen_flags: <defaults>
</compile_context>

<pallas_src>
import functools

import jax
import jax.numpy as jnp
from jax.experimental import pallas as pl
from jax.experimental.pallas import tpu as pltpu

_EPS = 1e-6  # PyTorch pairwise_distance default eps (added element-wise: the PyTorch quirk)


def _vmem_config():
    """(input_tile_budget_bytes, vmem_limit_bytes), generation-aware."""
    cap = None
    try:
        cap = getattr(pltpu.get_tpu_info(), "vmem_capacity_bytes", None)
    except Exception:
        cap = None
    if cap is None:
        return 24 * 1024 * 1024, 32 * 1024 * 1024          # safe everywhere
    if cap >= 100 * 1024 * 1024:                           # v5e / v6e: 128 MiB physical
        return 64 * 1024 * 1024, 96 * 1024 * 1024
    return 36 * 1024 * 1024, 48 * 1024 * 1024              # v7x: 64 MiB physical


def _choose_block_rows(B, D, itemsize, budget):
    """Largest batch-tile whose full VMEM working set fits the budget."""
    align = 8 * (4 // itemsize)          # sublane tile: 8 (f32), 16 (bf16), 32 (int8)
    # per tile row: 3 inputs x 2 pipeline buffers at native dtype
    #             + ~5 tile-sized f32 temporaries (a/p/n upcasts, diff, square)
    bytes_per_row = D * (6 * itemsize + 5 * 4)
    tb = max(align, (budget // bytes_per_row) // align * align)
    if B <= tb:
        return B                         # single block == full batch dim (always legal)
    return tb
    # TODO(synk): for extremely wide embeddings (D ~ 8K+ where even `align` rows overflow
    # the budget) add an inner "arbitrary" D axis with a (TB, 1) sum-of-squares scratch.


def _triplet_kernel(a_ref, p_ref, n_ref, o_ref, *, margin, batch, block_rows, mask_rows):
    a = a_ref[...].astype(jnp.float32)
    p = p_ref[...].astype(jnp.float32)
    n = n_ref[...].astype(jnp.float32)

    # pairwise L2 distance per row (reduction over the lane axis -> XLU)
    dp = a - p + _EPS
    dn = a - n + _EPS
    pos_dist = jnp.sqrt(jnp.sum(dp * dp, axis=-1, keepdims=True))  # (TB, 1)
    neg_dist = jnp.sqrt(jnp.sum(dn * dn, axis=-1, keepdims=True))  # (TB, 1)

    losses = jnp.maximum(pos_dist - neg_dist + margin, 0.0)        # clamp(min=0)

    if mask_rows:
        # Only emitted when B % TB != 0 (trace-time check): mask padded rows of the
        # ragged last tile so they never contribute to the partial sum.
        i = pl.program_id(0)
        row_id = i * block_rows + jax.lax.broadcasted_iota(jnp.int32, losses.shape, 0)
        losses = jnp.where(row_id < batch, losses, 0.0)

    # Each grid step owns its own (1,1) output block -> safe under "parallel".
    o_ref[...] = jnp.sum(losses, keepdims=True)


def triplet_loss(anchor, positive, negative, margin=1.0, *, block_rows=None):
    """Pallas TPU implementation of TripletLoss.forward. Returns a scalar (f32)."""
    B, D = anchor.shape
    itemsize = jnp.dtype(anchor.dtype).itemsize
    input_budget, vmem_limit = _vmem_config()
    tb = _choose_block_rows(B, D, itemsize, input_budget) if block_rows is None else block_rows
    num_tiles = pl.cdiv(B, tb)

    kernel = functools.partial(
        _triplet_kernel, margin=float(margin), batch=B, block_rows=tb,
        mask_rows=(B % tb != 0))

    cost = pl.CostEstimate(
        flops=5 * B * D,                 # 2 subs, 2 squares, ~1 add per element-pair
        transcendentals=2 * B,           # two sqrts per row
        bytes_accessed=3 * B * D * itemsize + 4 * num_tiles,
    )

    partials = pl.pallas_call(
        kernel,
        out_shape=jax.ShapeDtypeStruct((num_tiles, 1), jnp.float32),
        grid=(num_tiles,),
        in_specs=[
            pl.BlockSpec((tb, D), lambda i: (i, 0)),
            pl.BlockSpec((tb, D), lambda i: (i, 0)),
            pl.BlockSpec((tb, D), lambda i: (i, 0)),
        ],
        # One distinct partial-sum block per grid step -> batch axis is truly parallel
        # (sharded across both TensorCores on v7x; neutral on v5e/v6e).
        out_specs=pl.BlockSpec((1, 1), lambda i: (i, 0)),
        compiler_params=pltpu.CompilerParams(
            dimension_semantics=("parallel",),
            vmem_limit_bytes=vmem_limit,
        ),
        cost_estimate=cost,
    )(anchor, positive, negative)

    # Tiny final reduction + mean over the true batch size in plain JAX.
    return jnp.sum(partials) / jnp.float32(B)


def _triplet_loss_ref(anchor, positive, negative, margin=1.0):
    # Pure-JAX reference for correctness checking (matches PyTorch incl. +eps quirk).
    a = anchor.astype(jnp.float32)
    p = positive.astype(jnp.float32)
    n = negative.astype(jnp.float32)
    pos = jnp.sqrt(jnp.sum((a - p + _EPS) ** 2, axis=-1))
    neg = jnp.sqrt(jnp.sum((a - n + _EPS) ** 2, axis=-1))
    return jnp.mean(jnp.maximum(pos - neg + margin, 0.0))


if __name__ == "__main__":
    key = jax.random.PRNGKey(0)

    # Case 1: small single-block case (batch=8, hidden=128).
    B, D = 8, 128
    ka, kp, kn = jax.random.split(key, 3)
    anchor = jax.random.normal(ka, (B, D), dtype=jnp.float32)
    positive = jax.random.normal(kp, (B, D), dtype=jnp.float32)
    negative = jax.random.normal(kn, (B, D), dtype=jnp.float32)

    out = jax.block_until_ready(triplet_loss(anchor, positive, negative, margin=1.0))
    ref = _triplet_loss_ref(anchor, positive, negative, margin=1.0)
    assert jnp.allclose(out, ref, atol=1e-5, rtol=1e-5), (out, ref)

    # Case 2: exercise the parallel per-tile partial sums + ragged-tile masking path
    # (batch=20 with forced 8-row tiles -> 3 grid steps, last tile padded).
    B2, D2 = 20, 128
    kb = jax.random.split(key, 6)
    anchor2 = jax.random.normal(kb[3], (B2, D2), dtype=jnp.float32)
    positive2 = jax.random.normal(kb[4], (B2, D2), dtype=jnp.float32)
    negative2 = jax.random.normal(kb[5], (B2, D2), dtype=jnp.float32)

    out2 = jax.block_until_ready(
        triplet_loss(anchor2, positive2, negative2, margin=1.0, block_rows=8))
    ref2 = _triplet_loss_ref(anchor2, positive2, negative2, margin=1.0)
    assert jnp.allclose(out2, ref2, atol=1e-5, rtol=1e-5), (out2, ref2)

    # Case 3: bf16 at the HBM boundary (halves DMA traffic; kernel upcasts in-register).
    a_bf = anchor.astype(jnp.bfloat16)
    p_bf = positive.astype(jnp.bfloat16)
    n_bf = negative.astype(jnp.bfloat16)
    out3 = jax.block_until_ready(triplet_loss(a_bf, p_bf, n_bf, margin=1.0))
    ref3 = _triplet_loss_ref(a_bf, p_bf, n_bf, margin=1.0)
    assert jnp.allclose(out3, ref3, atol=1e-4, rtol=1e-4), (out3, ref3)

    print("KERNEL_OK")
</pallas_src>

<mosaic_0001>
module attributes {stable_mosaic.version = 11 : i64} {
  func.func @_triplet_kernel(%arg0: i32, %arg1: memref<8x128xf32, #tpu.memory_space<vmem>>, %arg2: memref<8x128xf32, #tpu.memory_space<vmem>>, %arg3: memref<8x128xf32, #tpu.memory_space<vmem>>, %arg4: memref<1x1xf32, #tpu.memory_space<vmem>>) attributes {dimension_semantics = [#tpu.dimension_semantics<parallel>], iteration_bounds = array<i64: 1>, scalar_prefetch = 0 : i64, scratch_operands = 0 : i64, tpu.core_type = #tpu.core_type<tc>, window_params = [{transform_indices = @transform_0, window_bounds = array<i64: 8, 128>}, {transform_indices = @transform_1, window_bounds = array<i64: 8, 128>}, {transform_indices = @transform_2, window_bounds = array<i64: 8, 128>}, {transform_indices = @transform_3, window_bounds = array<i64: 1, 1>}]} {
    %c0 = arith.constant 0 : index
    %c0_0 = arith.constant 0 : index
    %0 = vector.load %arg1[%c0, %c0_0] : memref<8x128xf32, #tpu.memory_space<vmem>>, vector<8x128xf32>
    %c0_1 = arith.constant 0 : index
    %c0_2 = arith.constant 0 : index
    %1 = vector.load %arg2[%c0_1, %c0_2] : memref<8x128xf32, #tpu.memory_space<vmem>>, vector<8x128xf32>
    %c0_3 = arith.constant 0 : index
    %c0_4 = arith.constant 0 : index
    %2 = vector.load %arg3[%c0_3, %c0_4] : memref<8x128xf32, #tpu.memory_space<vmem>>, vector<8x128xf32>
    %3 = arith.subf %0, %1 : vector<8x128xf32>
    %cst = arith.constant 9.99999997E-7 : f32
    %4 = vector.broadcast %cst : f32 to vector<8x128xf32>
    %5 = arith.addf %3, %4 : vector<8x128xf32>
    %6 = arith.subf %0, %2 : vector<8x128xf32>
    %cst_5 = arith.constant 9.99999997E-7 : f32
    %7 = vector.broadcast %cst_5 : f32 to vector<8x128xf32>
    %8 = arith.addf %6, %7 : vector<8x128xf32>
    %9 = arith.mulf %5, %5 : vector<8x128xf32>
    %cst_6 = arith.constant dense<0.000000e+00> : vector<8xf32>
    %10 = vector.multi_reduction <add>, %9, %cst_6 [1] : vector<8x128xf32> to vector<8xf32>
    %11 = vector.shape_cast %10 : vector<8xf32> to vector<8x1xf32>
    %12 = math.sqrt %11 : vector<8x1xf32>
    %13 = arith.mulf %8, %8 : vector<8x128xf32>
    %cst_7 = arith.constant dense<0.000000e+00> : vector<8xf32>
    %14 = vector.multi_reduction <add>, %13, %cst_7 [1] : vector<8x128xf32> to vector<8xf32>
    %15 = vector.shape_cast %14 : vector<8xf32> to vector<8x1xf32>
    %16 = math.sqrt %15 : vector<8x1xf32>
    %17 = arith.subf %12, %16 : vector<8x1xf32>
    %cst_8 = arith.constant 1.000000e+00 : f32
    %18 = vector.broadcast %cst_8 : f32 to vector<8x1xf32>
    %19 = arith.addf %17, %18 : vector<8x1xf32>
    %cst_9 = arith.constant 0.000000e+00 : f32
    %20 = vector.broadcast %cst_9 : f32 to vector<8x1xf32>
    %21 = arith.maximumf %19, %20 : vector<8x1xf32>
    %22 = vector.shape_cast %21 : vector<8x1xf32> to vector<1x8x1xf32>
    %cst_10 = arith.constant dense<0.000000e+00> : vector<1xf32>
    %23 = vector.multi_reduction <add>, %22, %cst_10 [1, 2] : vector<1x8x1xf32> to vector<1xf32>
    %24 = vector.shape_cast %23 : vector<1xf32> to vector<1x1x1xf32>
    %25 = vector.extract %24[0, 0, 0] : f32 from vector<1x1x1xf32>
    %26 = vector.broadcast %25 : f32 to vector<1x1xf32>
    %c0_11 = arith.constant 0 : index
    %c0_12 = arith.constant 0 : index
    %27 = vector.load %arg4[%c0_11, %c0_12] : memref<1x1xf32, #tpu.memory_space<vmem>>, vector<1x1xf32>
    tpu.vector_store %arg4[%c0_11, %c0_12], %26 {strides = array<i32>} : memref<1x1xf32, #tpu.memory_space<vmem>>, vector<1x1xf32>,
    return
  }
  func.func @transform_0(%arg0: i32) -> (i32, i32) {
    %c0_i32 = arith.constant 0 : i32
    %c0_i32_0 = arith.constant 0 : i32
    return %arg0, %c0_i32 : i32, i32
  }
  func.func @transform_1(%arg0: i32) -> (i32, i32) {
    %c0_i32 = arith.constant 0 : i32
    %c0_i32_0 = arith.constant 0 : i32
    return %arg0, %c0_i32 : i32, i32
  }
  func.func @transform_2(%arg0: i32) -> (i32, i32) {
    %c0_i32 = arith.constant 0 : i32
    %c0_i32_0 = arith.constant 0 : i32
    return %arg0, %c0_i32 : i32, i32
  }
  func.func @transform_3(%arg0: i32) -> (i32, i32) {
    %c0_i32 = arith.constant 0 : i32
    %c0_i32_0 = arith.constant 0 : i32
    return %arg0, %c0_i32 : i32, i32
  }
}

</mosaic_0001>

<bundles_post_ra>
// kernel: tpu_custom_call.1
= control target key start
LH: loop header
LB: loop body
LE: loop exit
PB: predicated region body
PF: predicated region fallthrough
CT: control target
= control target key end

     0   :  { %8 = vsyncpa [#allocation3], 0  ;;  %s242_s0 = inlined_call_operand.hbm [shape: f32[8,128], index: 0, kind: input, shape index: {}]   ;;  %s243_s1 = inlined_call_operand.hbm [shape: f32[8,128], index: 1, kind: input, shape index: {}]   ;;  %s244_s2 = inlined_call_operand.hbm [shape: f32[8,128], index: 2, kind: input, shape index: {}]   ;;  %s245_s3 = inlined_call_operand.hbm [shape: f32[1,1], index: 3, kind: output, shape index: {}]  }
   0x1   :  { %9 = vsyncpa [#allocation6], 0 }
   0x2   :  { %10 = vsyncpa [#allocation4], 0  ;;  %s206_s12 = smov [#allocation5]   ;;  %s207_s14 = smov [#allocation2]  }
   0x3   :  { %s27_s13 = sshll.u32 %s206_s12, 4  ;;  %s17_s15 = sshll.u32 %s207_s14, 4  ;;  %s28_s13 = int_to_ptr.vmem [resolvable:$true] %s27_s13  ;;  %s18_s15 = int_to_ptr.vmem [resolvable:$true] %s17_s15 }
   0x4   :  { %s128_s16 = scalar_lea.vmem %s28_s13, 128  ;;  %p133_p1 = scmp.lt.s32.totalorder %s28_s13, %s28_s13 }
   0x5   :  { %p129_p0 = scmp.ne.s32.totalorder %s28_s13, %s128_s16  ;;  %p134_p2 = scmp.lt.s32.totalorder %s128_s16, %s128_s16 }
   0x7   :  { %p135_p3 = por %p134_p2, %p133_p1 }
   0x9   :  { %p136_p4 = pnand %p135_p3, %p129_p0 }
   0xb   :  { %139 = shalt.err (!%p136_p4)
}
   0xc   :  { %30 = dma.hbm_to_vmem [thread:$0]  %s243_s1, 128, %s28_s13, [#allocation6]  }
   0xd   :  { %s148_s19 = scalar_lea.vmem %s18_s15, 128  ;;  %p153_p6 = scmp.lt.s32.totalorder %s18_s15, %s18_s15 }
   0xe   :  { %p149_p5 = scmp.ne.s32.totalorder %s18_s15, %s148_s19  ;;  %p154_p7 = scmp.lt.s32.totalorder %s148_s19, %s148_s19 }
  0x10   :  { %p155_p8 = por %p154_p7, %p153_p6 }
  0x12   :  { %p156_p9 = pnand %p155_p8, %p149_p5 }
  0x14   :  { %159 = shalt.err (!%p156_p9)
}
  0x15   :  { %20 = dma.hbm_to_vmem [thread:$0]  %s242_s0, 128, %s18_s15, [#allocation3]  }
  0x16   :  { %s208_s22 = smov [#allocation7]  }
  0x17   :  { %s37_s23 = sshll.u32 %s208_s22, 4  ;;  %s38_s23 = int_to_ptr.vmem [resolvable:$true] %s37_s23 }
  0x18   :  { %s168_s24 = scalar_lea.vmem %s38_s23, 128  ;;  %p173_p11 = scmp.lt.s32.totalorder %s38_s23, %s38_s23 }
  0x19   :  { %p169_p10 = scmp.ne.s32.totalorder %s38_s23, %s168_s24  ;;  %p174_p12 = scmp.lt.s32.totalorder %s168_s24, %s168_s24 }
  0x1b   :  { %p175_p13 = por %p174_p12, %p173_p11 }
  0x1d   :  { %p176_p0 = pnand %p175_p13, %p169_p10 }
  0x1f   :  { %179 = shalt.err (!%p176_p0)
}
  0x20   :  { %40 = dma.hbm_to_vmem [thread:$0]  %s244_s2, 128, %s38_s23, [#allocation6]  }
  0x21   :  { %200 = dma.done.wait [#allocation3], 128  }
  0x22   :  { %201 = vsyncadd [#allocation3], 4294967168 }
  0x23   :  { %202 = dma.done.wait [#allocation6], 256  }
  0x24   :  { %203 = vsyncadd [#allocation6], 4294967040  ;;  %v50_v0 = vld [vmem:[#allocation2] sm:$0xff]  ;;  %v51_v1 = vld [vmem:[#allocation5] sm:$0xff]  ;;  %vm80_vm4 = vcmask 7168   ;;  %s209_s0 = smov [#allocation8]  }
  0x25   :  { %v52_v2 = vld [vmem:[#allocation7] sm:$0xff]  ;;  %v53_v3 = vsub.f32 %v50_v0, %v51_v1  ;;  %s100_s2 = sshll.u32 %s209_s0, 4  ;;  %vm92_vm5 = vcmask 0   ;;  %s101_s2 = int_to_ptr.vmem [resolvable:$true] %s100_s2 }
  0x26   :  { %v55_v4 = vsub.f32 %v50_v0, %v52_v2  ;;  %s180_s27 = scalar_lea.vmem %s101_s2, 16  ;;  %s184_s28 = scalar_lea.vmem %s101_s2, 32 }
  0x27   :  { %v54_v5 = vadd.f32 1e-06, %v53_v3  ;;  %p181_p1 = scmp.ne.s32.totalorder %s101_s2, %s180_s27  ;;  %p185_p2 = scmp.lt.s32.totalorder %s101_s2, %s101_s2 }
  0x28   :  { %v56_v6 = vadd.f32 1e-06, %v55_v4  ;;  %p186_p3 = scmp.lt.s32.totalorder %s184_s28, %s180_s27 }
  0x29   :  { %v57_v7 = vmul.f32 %v54_v5, %v54_v5 }
  0x2a   :  { %v67_v8 = vmul.f32 %v56_v6, %v56_v6  ;;  %p187_p4 = por %p186_p3, %p185_p2 }
  0x2b   :  { %58 = vadd.xlane.f32.xlu0 %v57_v7 }
  0x2c   :  { %p188_p5 = pnand %p187_p4, %p181_p1 }
  0x2f   :  { %68 = vadd.xlane.f32.xlu0 %v67_v8 }
  0xb4   :  { %v59_v9 = vpop.xlane.xlu0 %58 }
  0xb5   :  { %116 = vrsqrt.f32 %v59_v9  ;;  %vm62_vm0 = vcmp.eq.f32.partialorder %v59_v9, inf  ;;  %v65_v16 = vand.u32 2147483648, %v59_v9  ;;  %vm64_vm2 = vcmp.eq.f32.partialorder %v59_v9, 0.0 }
  0xb8   :  { %v69_v10 = vpop.xlane.xlu0 %68 }
  0xb9   :  { %118 = vrsqrt.f32 %v69_v10  ;;  %vm72_vm1 = vcmp.eq.f32.partialorder %v69_v10, inf  ;;  %v75_v17 = vand.u32 2147483648, %v69_v10  ;;  %vm74_vm3 = vcmp.eq.f32.partialorder %v69_v10, 0.0 }
  0xc2   :  { %v117_v11 = vpop.eup %116 }
  0xc3   :  { %v61_v12 = vmul.f32 %v117_v11, %v59_v9 }
  0xc5   :  { %v63_v15 = vsel %vm62_vm0, %v59_v9, %v61_v12 }
  0xc6   :  { %v119_v13 = vpop.eup %118  ;;  %v66_v19 = vsel %vm64_vm2, %v65_v16, %v63_v15 }
  0xc7   :  { %v71_v14 = vmul.f32 %v119_v13, %v69_v10 }
  0xc9   :  { %v73_v18 = vsel %vm72_vm1, %v69_v10, %v71_v14 }
  0xca   :  { %v76_v20 = vsel %vm74_vm3, %v75_v17, %v73_v18 }
  0xcb   :  { %v77_v21 = vsub.f32 %v66_v19, %v76_v20 }
  0xcd   :  { %v78_v22 = vadd.f32 1.0, %v77_v21 }
  0xcf   :  { %v79_v23 = vmax.f32 %v78_v22, 0.0 }
  0xd1   :  { %v81_v24 = vsel %vm80_vm4, %v79_v23, 0.0 }
  0xd2   :  { %82 = vadd.xlane.f32.xlu1 %v81_v24 }
 0x15b   :  { %v83_v25 = vpop.xlane.xlu1 %82 }
 0x15c   :  { %v84_v26 = vrot.slane %v83_v25, 4 }
 0x15e   :  { %v85_v27 = vadd.f32 %v84_v26, %v83_v25 }
 0x160   :  { %v86_v28 = vrot.slane %v85_v27, 2 }
 0x162   :  { %v87_v29 = vadd.f32 %v86_v28, %v85_v27 }
 0x164   :  { %v88_v30 = vrot.slane %v87_v29, 1 }
 0x166   :  { %v89_v31 = vadd.f32 %v88_v30, %v87_v29 }
 0x168   :  { %110 = vpush %v89_v31 }
 0x199   :  { %s111_s26 = spop %110 }
 0x19a   :  { %v91_v32 = vstv %s111_s26 }
 0x19b   :  { %93 = vst.msk [vmem:[#allocation8] sm:$0x1] %vm92_vm5, %v91_v32 }
 0x19c   :  { %191 = shalt.err (!%p188_p5)
}
 0x19d   :  { %103 = dma.vmem_to_hbm [thread:$0]  %s101_s2, 16, %s245_s3, [#allocation4]  }
 0x19e   :  { %204 = dma.done.wait [#allocation4], 16  }
 0x19f   :  { %205 = vsyncadd [#allocation4], 4294967280 }
 0x1a0   :  { %107 = vsyncpa [#allocation3], 1 }
 0x1a1   :  { %108 = vsyncpa [#allocation6], 1 }
 0x1a2   :  { %109 = vsyncpa [#allocation4], 1 }

</bundles_post_ra>
